<compile_context>
chip_gen: v7x
topology: tpu7x:2x2x1
jax: 0.10.0
libtpu: 0.0.40
codegen_flags: <defaults>
</compile_context>

<pallas_src>
import jax
import jax.numpy as jnp
import numpy as np
from jax.experimental import pallas as pl
from jax.experimental.pallas import tpu as pltpu


def _make_sca_kernel(lam, B, Bb, R, T, D):
    """Kernel factory; everything captured is a Python scalar (no jax consts)."""
    needs_tail_scrub = (B % Bb) != 0

    def kernel(mask_ref, s_ref, img_ref, out_ref):
        # mask_ref: (1, Bb*T)   s_ref: (R, Bb*T)   img_ref: (Bb, R, D)
        # out_ref : (Bb, T, D)
        valid = mask_ref[...] != 0                                   # (1, Bb*T)

        # ---- lane-dense softmax over regions (sublane axis R) ----
        s = s_ref[...].astype(jnp.float32)                           # (R, Bb*T)
        logits = jnp.where(valid, lam * s, -1e30)                    # finite -inf stand-in
        m = jnp.max(logits, axis=0, keepdims=True)                   # (1, Bb*T)
        e = jnp.exp(logits - m)                                      # (R, Bb*T)
        denom = jnp.sum(e, axis=0, keepdims=True)                    # (1, Bb*T)
        alpha = e / denom                                            # exact normalization
        alpha = jnp.where(valid, alpha, 0.0)                         # zero masked tokens

        # ---- single block-diagonal MXU matmul ----
        # out[b*T+t, d] = sum_r alpha[r, b*T+t] * img[b, r, d]
        alpha_t = alpha.T                                            # (Bb*T, R)
        alpha_tiled = jnp.concatenate([alpha_t] * Bb, axis=1)        # (Bb*T, Bb*R)
        # batch id of each output row, built without integer division
        row_b = jax.lax.broadcasted_iota(jnp.int32, (Bb, T, Bb * R), 0)
        row_b = row_b.reshape(Bb * T, Bb * R)
        col = jax.lax.broadcasted_iota(jnp.int32, (Bb * T, Bb * R), 1)
        on_diag = (col >= row_b * R) & (col < row_b * R + R)
        alpha_bd = jnp.where(on_diag, alpha_tiled, 0.0).astype(jnp.bfloat16)

        img_blk = img_ref[...]
        if needs_tail_scrub:
            # Partial last block: zero padded batches so 0 * garbage can never
            # inject NaN into valid output rows of the matmul.
            b_idx = jax.lax.broadcasted_iota(jnp.int32, (Bb, R, D), 0)
            img_blk = jnp.where(b_idx + pl.program_id(0) * Bb < B, img_blk, 0)
        img_flat = img_blk.reshape(Bb * R, D).astype(jnp.bfloat16)   # (Bb*R, D)

        out_flat = jnp.dot(alpha_bd, img_flat,
                           preferred_element_type=jnp.float32)       # (Bb*T, D) f32
        out_ref[...] = out_flat.reshape(Bb, T, D).astype(out_ref.dtype)

    return kernel


def _chip_info():
    """Per-generation block budget / VMEM cap / TensorCore count (defensive)."""
    kind = ""
    try:
        kind = jax.devices()[0].device_kind.lower()
    except Exception:
        pass
    if "v7" in kind:
        return {"budget": 20 << 20, "cap": 48 << 20, "cores": 2}   # 64 MiB VMEM, 2 TCs
    if ("v5" in kind) or ("v6" in kind):
        return {"budget": 44 << 20, "cap": 96 << 20, "cores": 1}   # 128 MiB VMEM, 1 TC
    # unknown backend (e.g. interpret): conservative, v7x-safe defaults
    return {"budget": 20 << 20, "cap": 48 << 20, "cores": 1}


def _pick_batch_block(B, T, footprint, budget, cores):
    """Largest batch block whose folded lane width (block_b*T) is 128-aligned
    (or covers the whole fold) and whose VMEM footprint fits the budget.
    On multi-TC chips prefer a step count that is a multiple of the core count."""
    legal = [d for d in range(1, B + 1) if (d * T) % 128 == 0 or d == B]
    fitting = [d for d in legal if footprint(d) <= budget]
    cand = fitting if fitting else [min(legal)]
    if cores > 1:
        def steps(d):
            return -(-B // d)
        balanced = [d for d in cand if steps(d) >= cores and steps(d) % cores == 0]
        if balanced:
            return max(balanced)
    return max(cand)


def stacked_cross_attention(h, mask, img, s_t, lambda_1, *, block_b=None):
    """h: [B, T, Dh] (unused), mask: [B, T] (0/1), img: [B, R, D], s_t: [B, R, T]."""
    del h  # unused by the PyTorch forward
    B, R, T = s_t.shape
    D = img.shape[-1]
    out_dtype = jnp.result_type(s_t.dtype, img.dtype)

    # Lane-dense fold: regions on the sublane axis, (batch*token) on the lane axis.
    # (Wrapper-side layout plumbing; softmax then runs on full 128-wide vregs.)
    s_fold = jnp.transpose(s_t, (1, 0, 2)).reshape(R, B * T)
    mask_fold = mask.reshape(1, B * T)          # natural dtype, compared != 0 in-kernel

    s_bytes = jnp.dtype(s_t.dtype).itemsize
    img_bytes = jnp.dtype(img.dtype).itemsize
    mask_bytes = jnp.dtype(mask.dtype).itemsize
    out_bytes = jnp.dtype(out_dtype).itemsize

    def footprint(d):
        # Only BlockSpec-DMA'd blocks are double-buffered; kernel working set is not.
        io = d * (R * T * s_bytes + T * mask_bytes + R * D * img_bytes + T * D * out_bytes)
        work = (3 * d * R * T * 4              # f32 logits / exp / alpha slabs
                + d * d * R * T * 6            # block-diagonal alpha (f32 build + bf16 operand)
                + d * R * D * 2                # bf16 img operand
                + d * T * D * 4)               # f32 MXU result before cast
        return 2 * io + work

    chip = _chip_info()
    if block_b is None:
        block_b = _pick_batch_block(B, T, footprint, chip["budget"], chip["cores"])
    block_b = min(block_b, B)

    grid = (pl.cdiv(B, block_b),)
    # Re-derive the VMEM limit from the chosen block (plus headroom), capped per-gen.
    vmem_limit = int(min(chip["cap"], max(2 * footprint(block_b), 32 << 20)))

    kernel = _make_sca_kernel(float(lambda_1), B, block_b, R, T, D)

    out = pl.pallas_call(
        kernel,
        out_shape=jax.ShapeDtypeStruct((B, T, D), out_dtype),
        grid_spec=pltpu.PrefetchScalarGridSpec(
            num_scalar_prefetch=0,
            grid=grid,
            in_specs=[
                pl.BlockSpec((1, block_b * T), lambda b: (0, b)),     # mask (folded)
                pl.BlockSpec((R, block_b * T), lambda b: (0, b)),     # s_t  (folded)
                pl.BlockSpec((block_b, R, D), lambda b: (b, 0, 0)),   # img
            ],
            out_specs=pl.BlockSpec((block_b, T, D), lambda b: (b, 0, 0)),
        ),
        compiler_params=pltpu.CompilerParams(
            dimension_semantics=("parallel",),
            vmem_limit_bytes=vmem_limit,
        ),
    )(mask_fold, s_fold, img)
    return out


def _reference(mask, img, s_t, lambda_1):
    """Pure-JAX reference mirroring the PyTorch forward (f32 math)."""
    valid = (mask != 0)[:, None, :]                                  # (B, 1, T)
    logits = jnp.where(valid, lambda_1 * s_t.astype(jnp.float32), -jnp.inf)
    alpha = jax.nn.softmax(logits, axis=1)                           # NaN on fully-masked cols
    alpha = jnp.where(valid, alpha, 0.0)
    return jnp.einsum("brt,brd->btd", alpha, img.astype(jnp.float32))


if __name__ == "__main__":
    key = jax.random.PRNGKey(0)
    B, R, T, D, Dh = 8, 8, 16, 128, 32    # B*T = 128 -> fully lane-dense softmax slab
    lambda_1 = 4.0

    k1, k2, k3 = jax.random.split(key, 3)
    h = jax.random.normal(k1, (B, T, Dh), dtype=jnp.float32)         # unused by forward
    img = jax.random.normal(k2, (B, R, D), dtype=jnp.float32)
    s_t = jax.random.normal(k3, (B, R, T), dtype=jnp.float32)

    # mask: first batch has 4 padded (masked-out) tokens, second has 2.
    mask = jnp.ones((B, T), dtype=jnp.float32)
    mask = mask.at[0, T - 4:].set(0.0)
    mask = mask.at[1, T - 2:].set(0.0)

    # --- f32 inputs (matches the PyTorch module's default dtype) ---
    out = jax.block_until_ready(stacked_cross_attention(h, mask, img, s_t, lambda_1))
    ref = _reference(mask, img, s_t, lambda_1)
    np.testing.assert_allclose(np.asarray(out), np.asarray(ref), rtol=2e-2, atol=2e-2)

    # --- bf16 HBM-resident inputs (halved DMA traffic; f32 softmax in-kernel) ---
    out_bf16 = jax.block_until_ready(
        stacked_cross_attention(
            h, mask, img.astype(jnp.bfloat16), s_t.astype(jnp.bfloat16), lambda_1))
    ref_bf16 = _reference(mask, img.astype(jnp.bfloat16), s_t.astype(jnp.bfloat16), lambda_1)
    np.testing.assert_allclose(
        np.asarray(out_bf16.astype(jnp.float32)), np.asarray(ref_bf16),
        rtol=5e-2, atol=5e-2)

    print("KERNEL_OK")
</pallas_src>

<mosaic_0001>
module attributes {stable_mosaic.version = 11 : i64} {
  func.func @kernel(%arg0: i32, %arg1: memref<1x128xf32, #tpu.memory_space<vmem>>, %arg2: memref<8x128xf32, #tpu.memory_space<vmem>>, %arg3: memref<8x8x128xf32, #tpu.memory_space<vmem>>, %arg4: memref<8x16x128xf32, #tpu.memory_space<vmem>>) attributes {dimension_semantics = [#tpu.dimension_semantics<parallel>], iteration_bounds = array<i64: 1>, scalar_prefetch = 0 : i64, scratch_operands = 0 : i64, tpu.core_type = #tpu.core_type<tc>, window_params = [{transform_indices = @transform_0, window_bounds = array<i64: 1, 128>}, {transform_indices = @transform_1, window_bounds = array<i64: 8, 128>}, {transform_indices = @transform_2, window_bounds = array<i64: 8, 8, 128>}, {transform_indices = @transform_3, window_bounds = array<i64: 8, 16, 128>}]} {
    %c0 = arith.constant 0 : index
    %c0_0 = arith.constant 0 : index
    %0 = vector.load %arg1[%c0, %c0_0] : memref<1x128xf32, #tpu.memory_space<vmem>>, vector<1x128xf32>
    %cst = arith.constant 0.000000e+00 : f32
    %1 = vector.broadcast %cst : f32 to vector<1x128xf32>
    %2 = arith.cmpf one, %0, %1 : vector<1x128xf32>
    %c0_1 = arith.constant 0 : index
    %c0_2 = arith.constant 0 : index
    %3 = vector.load %arg2[%c0_1, %c0_2] : memref<8x128xf32, #tpu.memory_space<vmem>>, vector<8x128xf32>
    %cst_3 = arith.constant 4.000000e+00 : f32
    %4 = vector.broadcast %cst_3 : f32 to vector<8x128xf32>
    %5 = arith.mulf %4, %3 : vector<8x128xf32>
    %cst_4 = arith.constant -1.000000e+30 : f32
    %6 = vector.shape_cast %2 : vector<1x128xi1> to vector<1x128xi1>
    %7 = vector.broadcast %6 : vector<1x128xi1> to vector<8x128xi1>
    %8 = vector.broadcast %cst_4 : f32 to vector<8x128xf32>
    %9 = arith.select %7, %5, %8 : vector<8x128xi1>, vector<8x128xf32>
    %cst_5 = arith.constant dense<0xFF800000> : vector<128xf32>
    %10 = vector.multi_reduction <maximumf>, %9, %cst_5 [0] : vector<8x128xf32> to vector<128xf32>
    %11 = vector.shape_cast %10 : vector<128xf32> to vector<1x128xf32>
    %12 = vector.broadcast %11 : vector<1x128xf32> to vector<8x128xf32>
    %13 = arith.subf %9, %12 : vector<8x128xf32>
    %14 = math.exp %13 : vector<8x128xf32>
    %cst_6 = arith.constant dense<0.000000e+00> : vector<128xf32>
    %15 = vector.multi_reduction <add>, %14, %cst_6 [0] : vector<8x128xf32> to vector<128xf32>
    %16 = vector.shape_cast %15 : vector<128xf32> to vector<1x128xf32>
    %17 = vector.broadcast %16 : vector<1x128xf32> to vector<8x128xf32>
    %18 = arith.divf %14, %17 : vector<8x128xf32>
    %cst_7 = arith.constant 0.000000e+00 : f32
    %19 = vector.shape_cast %2 : vector<1x128xi1> to vector<1x128xi1>
    %20 = vector.broadcast %19 : vector<1x128xi1> to vector<8x128xi1>
    %21 = vector.broadcast %cst_7 : f32 to vector<8x128xf32>
    %22 = arith.select %20, %18, %21 : vector<8x128xi1>, vector<8x128xf32>
    %23 = tpu.transpose %22, [1, 0] : vector<8x128xf32> -> vector<128x8xf32>
    %24 = tpu.concatenate %23, %23, %23, %23, %23, %23, %23, %23 in 1 : vector<128x8xf32>, vector<128x8xf32>, vector<128x8xf32>, vector<128x8xf32>, vector<128x8xf32>, vector<128x8xf32>, vector<128x8xf32>, vector<128x8xf32> -> vector<128x64xf32>
    %25 = tpu.iota {dimensions = array<i32: 0>} : vector<8x16x64xi32>
    %26 = vector.shape_cast %25 : vector<8x16x64xi32> to vector<128x64xi32>
    %27 = tpu.iota {dimensions = array<i32: 1>} : vector<128x64xi32>
    %c8_i32 = arith.constant 8 : i32
    %28 = vector.broadcast %c8_i32 : i32 to vector<128x64xi32>
    %29 = arith.muli %26, %28 : vector<128x64xi32>
    %30 = arith.cmpi sge, %27, %29 : vector<128x64xi32>
    %c8_i32_8 = arith.constant 8 : i32
    %31 = vector.broadcast %c8_i32_8 : i32 to vector<128x64xi32>
    %32 = arith.muli %26, %31 : vector<128x64xi32>
    %c8_i32_9 = arith.constant 8 : i32
    %33 = vector.broadcast %c8_i32_9 : i32 to vector<128x64xi32>
    %34 = arith.addi %32, %33 : vector<128x64xi32>
    %35 = arith.cmpi slt, %27, %34 : vector<128x64xi32>
    %36 = arith.andi %30, %35 : vector<128x64xi1>
    %cst_10 = arith.constant 0.000000e+00 : f32
    %37 = vector.broadcast %cst_10 : f32 to vector<128x64xf32>
    %38 = arith.select %36, %24, %37 : vector<128x64xi1>, vector<128x64xf32>
    %39 = arith.truncf %38 : vector<128x64xf32> to vector<128x64xbf16>
    %c0_11 = arith.constant 0 : index
    %c0_12 = arith.constant 0 : index
    %c0_13 = arith.constant 0 : index
    %40 = vector.load %arg3[%c0_11, %c0_12, %c0_13] : memref<8x8x128xf32, #tpu.memory_space<vmem>>, vector<8x8x128xf32>
    %41 = vector.shape_cast %40 : vector<8x8x128xf32> to vector<64x128xf32>
    %42 = arith.truncf %41 : vector<64x128xf32> to vector<64x128xbf16>
    %cst_14 = arith.constant dense<0.000000e+00> : vector<128x128xf32>
    %43 = tpu.matmul %39, %42, %cst_14 {dimension_numbers = #tpu.dot_dimension_numbers<[1], [0], [0], [1], [0, 0, 1, 1], [], []>} : vector<128x64xbf16>, vector<64x128xbf16>, vector<128x128xf32> -> vector<128x128xf32>
    %44 = vector.shape_cast %43 : vector<128x128xf32> to vector<8x16x128xf32>
    %c0_15 = arith.constant 0 : index
    %c0_16 = arith.constant 0 : index
    %c0_17 = arith.constant 0 : index
    %45 = vector.load %arg4[%c0_15, %c0_16, %c0_17] : memref<8x16x128xf32, #tpu.memory_space<vmem>>, vector<8x16x128xf32>
    tpu.vector_store %arg4[%c0_15, %c0_16, %c0_17], %44 {strides = array<i32>} : memref<8x16x128xf32, #tpu.memory_space<vmem>>, vector<8x16x128xf32>,
    return
  }
  func.func @transform_0(%arg0: i32) -> (i32, i32) {
    %c0_i32 = arith.constant 0 : i32
    %c0_i32_0 = arith.constant 0 : i32
    return %c0_i32, %arg0 : i32, i32
  }
  func.func @transform_1(%arg0: i32) -> (i32, i32) {
    %c0_i32 = arith.constant 0 : i32
    %c0_i32_0 = arith.constant 0 : i32
    return %c0_i32, %arg0 : i32, i32
  }
  func.func @transform_2(%arg0: i32) -> (i32, i32, i32) {
    %c0_i32 = arith.constant 0 : i32
    %c0_i32_0 = arith.constant 0 : i32
    %c0_i32_1 = arith.constant 0 : i32
    return %arg0, %c0_i32, %c0_i32_0 : i32, i32, i32
  }
  func.func @transform_3(%arg0: i32) -> (i32, i32, i32) {
    %c0_i32 = arith.constant 0 : i32
    %c0_i32_0 = arith.constant 0 : i32
    %c0_i32_1 = arith.constant 0 : i32
    return %arg0, %c0_i32, %c0_i32_0 : i32, i32, i32
  }
}

</mosaic_0001>

<bundles_post_ra>
// kernel: tpu_custom_call.1
= control target key start
LH: loop header
LB: loop body
LE: loop exit
PB: predicated region body
PF: predicated region fallthrough
CT: control target
= control target key end

     0   :  { %8 = vsyncpa [#allocation3], 0  ;;  %s1652_s0 = inlined_call_operand.hbm [shape: f32[1,128], index: 0, kind: input, shape index: {}]   ;;  %s1653_s1 = inlined_call_operand.hbm [shape: f32[8,128], index: 1, kind: input, shape index: {}]   ;;  %s1654_s2 = inlined_call_operand.hbm [shape: f32[8,8,128], index: 2, kind: input, shape index: {}]   ;;  %s1655_s3 = inlined_call_operand.hbm [shape: f32[8,16,128], index: 3, kind: output, shape index: {}]  }
   0x1   :  { %9 = vsyncpa [#allocation6], 0 }
   0x2   :  { %10 = vsyncpa [#allocation4], 0  ;;  %s1247_s12 = smov [#allocation5]   ;;  %s1248_s14 = smov [#allocation2]  }
   0x3   :  { %s27_s13 = sshll.u32 %s1247_s12, 4  ;;  %s17_s15 = sshll.u32 %s1248_s14, 4  ;;  %s28_s13 = int_to_ptr.vmem [resolvable:$true] %s27_s13  ;;  %s18_s15 = int_to_ptr.vmem [resolvable:$true] %s17_s15 }
   0x4   :  { %s1153_s18 = scalar_lea.hbm %s1653_s1, 128 }
   0x5   :  { %p1154_p0 = scmp.ne.s32.totalorder %s1653_s1, %s1153_s18  ;;  %p1157_p1 = scmp.lt.u32.totalorder %s1153_s18, %s1653_s1 }
   0x7   :  { %p1159_p2 = pnand %p1157_p1, %p1154_p0 }
   0x9   :  { %1162 = shalt.err (!%p1159_p2)
}
   0xa   :  { %s1163_s23 = scalar_lea.vmem %s28_s13, 128  ;;  %p1168_p4 = scmp.lt.s32.totalorder %s28_s13, %s28_s13 }
   0xb   :  { %p1164_p3 = scmp.ne.s32.totalorder %s28_s13, %s1163_s23  ;;  %p1169_p5 = scmp.lt.s32.totalorder %s1163_s23, %s1163_s23 }
   0xd   :  { %p1170_p6 = por %p1169_p5, %p1168_p4 }
   0xf   :  { %p1171_p7 = pnand %p1170_p6, %p1164_p3 }
  0x11   :  { %1174 = shalt.err (!%p1171_p7)
}
  0x12   :  { %30 = dma.hbm_to_vmem [thread:$0]  %s1653_s1, 128, %s28_s13, [#allocation6]  }
  0x13   :  { %s1175_s28 = scalar_lea.hbm %s1652_s0, 16 }
  0x14   :  { %p1176_p8 = scmp.ne.s32.totalorder %s1652_s0, %s1175_s28  ;;  %p1179_p9 = scmp.lt.u32.totalorder %s1175_s28, %s1652_s0 }
  0x16   :  { %p1181_p10 = pnand %p1179_p9, %p1176_p8 }
  0x18   :  { %1184 = shalt.err (!%p1181_p10)
}
  0x19   :  { %s1185_s6 = scalar_lea.vmem %s18_s15, 16  ;;  %s1189_s7 = scalar_lea.vmem %s18_s15, 32 }
  0x1a   :  { %p1186_p11 = scmp.ne.s32.totalorder %s18_s15, %s1185_s6  ;;  %p1190_p12 = scmp.lt.s32.totalorder %s18_s15, %s18_s15 }
  0x1b   :  { %p1191_p13 = scmp.lt.s32.totalorder %s1189_s7, %s1185_s6 }
  0x1d   :  { %p1192_p0 = por %p1191_p13, %p1190_p12 }
  0x1f   :  { %p1193_p1 = pnand %p1192_p0, %p1186_p11 }
  0x21   :  { %1196 = shalt.err (!%p1193_p1)
}
  0x22   :  { %20 = dma.hbm_to_vmem [thread:$0]  %s1652_s0, 16, %s18_s15, [#allocation3]  }
  0x23   :  { %s1249_s9 = smov [#allocation7]   ;;  %s1197_s13 = scalar_lea.hbm %s1654_s2, 1024 }
  0x24   :  { %s36_s10 = sshll.u32 %s1249_s9, 4  ;;  %p1198_p2 = scmp.ne.s32.totalorder %s1654_s2, %s1197_s13  ;;  %s37_s10 = int_to_ptr.vmem [resolvable:$true] %s36_s10 }
  0x25   :  { %p1201_p3 = scmp.lt.u32.totalorder %s1197_s13, %s1654_s2 }
  0x27   :  { %p1203_p4 = pnand %p1201_p3, %p1198_p2 }
  0x29   :  { %1206 = shalt.err (!%p1203_p4)
}
  0x2a   :  { %s1207_s19 = scalar_lea.vmem %s37_s10, 1024  ;;  %p1212_p6 = scmp.lt.s32.totalorder %s37_s10, %s37_s10 }
  0x2b   :  { %p1208_p5 = scmp.ne.s32.totalorder %s37_s10, %s1207_s19  ;;  %p1213_p7 = scmp.lt.s32.totalorder %s1207_s19, %s1207_s19 }
  0x2d   :  { %p1214_p8 = por %p1213_p7, %p1212_p6 }
  0x2f   :  { %p1215_p9 = pnand %p1214_p8, %p1208_p5 }
  0x31   :  { %1218 = shalt.err (!%p1215_p9)
}
  0x32   :  { %s1250_s0 = smov 128   ;;  %s1251_s15 = smov 8  }
  0x33   :  { %42 = dma.hbm_to_vmem [thread:$0]  %s1654_s2, 1024, %s37_s10, [#allocation6], %s1250_s0, %s1250_s0, %s1251_s15  }
  0x34   :  { %1241 = dma.done.wait [#allocation3], 16  }
  0x35   :  { %1242 = vsyncadd [#allocation3], 4294967280 }
  0x36   :  { %1243 = dma.done.wait [#allocation6], 1152  }
  0x37   :  { %1244 = vsyncadd [#allocation6], 4294966144  ;;  %v58_v0 = vlaneseq  ;;  %v53_v3 = vld [vmem:[#allocation2] sm:$0x1]  ;;  %v55_v4 = vld [vmem:[#allocation5] sm:$0xff]  ;;  %v1252_v6 = vmov 0  }
  0x38   :  { %vm54_vm0 = vcmp.ne.f32.partialorder %v53_v3, 0.0  ;;  %v56_v5 = vmul.f32 4.0, %v55_v4  ;;  %s1253_s2 = smov 16   ;;  %s1254_s22 = smov 24   ;;  %v635_v37 = vld [vmem:[#allocation7] sm:$0xff]  ;;  %v636_v38 = vld [vmem:[#allocation7 + $0x8] sm:$0xff] }
  0x39   :  { %v59_v1 = vshrl.u32 %v58_v0, 7  ;;  %v57_v7 = vsel %vm54_vm0, 1, %v1252_v6  ;;  %s1255_s23 = smov 32   ;;  %s1256_s24 = smov 40   ;;  %v643_v39 = vpack.c.bf16 %v636_v38, %v635_v37  ;;  %v637_v40 = vld [vmem:[#allocation7 + $0x10] sm:$0xff]  ;;  %v638_v41 = vld [vmem:[#allocation7 + $0x18] sm:$0xff] }
  0x3a   :  { %s1257_s25 = smov 48   ;;  %s1258_s26 = smov 56   ;;  %v644_v42 = vpack.c.bf16 %v638_v41, %v637_v40  ;;  %v639_v44 = vld [vmem:[#allocation7 + $0x20] sm:$0xff]  ;;  %v640_v45 = vld [vmem:[#allocation7 + $0x28] sm:$0xff]  ;;  %v641_v48 = vld [vmem:[#allocation7 + $0x30] sm:$0xff]  ;;  %vm466_vm2 = vcmask 64512  }
  0x3b   :  { %v60_v2 = vsub.s32 0, %v59_v1  ;;  %823 = vmatprep.subr.bf16.mxu0 %v643_v39  ;;  %847 = vmatprep.subr.bf16.mxu1 %v643_v39  ;;  %v645_v46 = vpack.c.bf16 %v640_v45, %v639_v44  ;;  %v642_v49 = vld [vmem:[#allocation7 + $0x38] sm:$0xff]  ;;  %vm483_vm3 = vcmask 130048   ;;  %vm500_vm4 = vcmask 195584   ;;  %s1259_s27 = smov [#allocation8]  }
  0x3c   :  { %824 = vmatpush3.bf16.msra.mxu0 %v643_v39  ;;  %851 = vmatpush3.bf16.msra.mxu1 %v643_v39  ;;  %v646_v50 = vpack.c.bf16 %v642_v49, %v641_v48  ;;  %vm517_vm5 = vcmask 261120   ;;  %vm534_vm6 = vcmask 326656   ;;  %vm551_vm7 = vcmask 392192   ;;  %s790_s28 = sshll.u32 %s1259_s27, 4  ;;  %s791_s28 = int_to_ptr.vmem [resolvable:$true] %s790_s28 }
  0x3d   :  { %v61_v8 = vrot.slane %v57_v7, %v60_v2  ;;  %825 = vmatprep.subr.bf16.mxu0 %v644_v42  ;;  %848 = vmatprep.subr.bf16.mxu1 %v644_v42  ;;  %v1416_v7 = vand.u32 127, %v58_v0  ;;  %vm568_vm8 = vcmask 457728   ;;  %vm647_vm10 = vcmask 523264   ;;  %s1219_s29 = scalar_lea.vmem %s791_s28, 2048  ;;  %p1224_p11 = scmp.lt.s32.totalorder %s791_s28, %s791_s28 }
  0x3e   :  { %p1220_p10 = scmp.ne.s32.totalorder %s791_s28, %s1219_s29  ;;  %p1225_p12 = scmp.lt.s32.totalorder %s1219_s29, %s1219_s29 }
  0x3f   :  { %vm62_vm1 = vcmp.eq.s32.totalorder %v61_v8, 1  ;;  %vm595_vm9 = vcmp.lt.s32.totalorder %v1416_v7, 8  ;;  %vm589_vm11 = vcmp.ge.s32.totalorder %v1416_v7, 16  ;;  %vm597_vm12 = vcmp.lt.s32.totalorder %v1416_v7, 24 }
  0x40   :  { %v63_v9 = vsel %vm62_vm1, %v56_v5, -1e+30  ;;  %826 = vmatpush3.bf16.msra.mxu0 %v644_v42  ;;  %852 = vmatpush3.bf16.msra.mxu1 %v644_v42  ;;  %vm588_vm13 = vcmp.ge.s32.totalorder %v1416_v7, 8  ;;  %vm596_vm14 = vcmp.lt.s32.totalorder %v1416_v7, 16  ;;  %vm1494_vm15 = vmand %vm589_vm11, %vm597_vm12  ;;  %vm591_vm11 = vcmp.ge.s32.totalorder %v1416_v7, 32  ;;  %p1226_p13 = por %p1225_p12, %p1224_p11 }
  0x41   :  { %v64_v10 = vrot.slane %v63_v9, 4  ;;  %827 = vmatprep.subr.bf16.mxu0 %v645_v46  ;;  %849 = vmatprep.subr.bf16.mxu1 %v645_v46  ;;  %vm604_vm0 = vmand %vm588_vm13, %vm596_vm14  ;;  %vm599_vm12 = vcmp.lt.s32.totalorder %v1416_v7, 40 }
  0x42   :  { %vm607_vm14 = vmand %vm591_vm11, %vm599_vm12  ;;  %vm601_vm11 = vcmp.lt.s32.totalorder %v1416_v7, 56  ;;  %p1227_p0 = pnand %p1226_p13, %p1220_p10 }
  0x43   :  { %v65_v11 = vmax.f32 %v63_v9, %v64_v10 }
  0x44   :  { %828 = vmatpush3.bf16.msra.mxu0 %v645_v46  ;;  %853 = vmatpush3.bf16.msra.mxu1 %v645_v46 }
  0x45   :  { %v66_v12 = vrot.slane %v65_v11, 2  ;;  %829 = vmatprep.subr.bf16.mxu0 %v646_v50  ;;  %850 = vmatprep.subr.bf16.mxu1 %v646_v50 }
  0x47   :  { %v67_v13 = vmax.f32 %v65_v11, %v66_v12 }
  0x48   :  { %830 = vmatpush3.bf16.msra.mxu0 %v646_v50  ;;  %854 = vmatpush3.bf16.msra.mxu1 %v646_v50 }
  0x49   :  { %v68_v14 = vrot.slane %v67_v13, 1 }
  0x4b   :  { %v69_v15 = vmax.f32 %v67_v13, %v68_v14 }
  0x4d   :  { %v70_v16 = vsub.f32 %v63_v9, %v69_v15 }
  0x4f   :  { %v71_v17 = vmul.f32 1.442695, %v70_v16 }
  0x51   :  { %1149 = vpow2.f32 %v71_v17 }
  0x5b   :  { %v1150_v18 = vpop.eup %1149 }
  0x5c   :  { %v73_v19 = vrot.slane %v1150_v18, 4 }
  0x5e   :  { %v74_v20 = vadd.f32 %v1150_v18, %v73_v19 }
  0x60   :  { %v75_v21 = vrot.slane %v74_v20, 2 }
  0x62   :  { %v76_v22 = vadd.f32 %v75_v21, %v74_v20 }
  0x64   :  { %v77_v23 = vrot.slane %v76_v22, 1 }
  0x66   :  { %v78_v24 = vadd.f32 %v77_v23, %v76_v22 }
  0x68   :  { %1151 = vrcp.f32 %v78_v24 }
  0x72   :  { %v1152_v25 = vpop.eup %1151 }
  0x73   :  { %v80_v26 = vmul.f32 %v1152_v25, %v1150_v18 }
  0x75   :  { %v81_v27 = vsel %vm62_vm1, %v80_v26, 0.0  ;;  %vm590_vm1 = vcmp.ge.s32.totalorder %v1416_v7, 24 }
  0x76   :  { %82 = vxpose.xlu0.b32.start.end [1/1] (short) %v81_v27, 128 }
  0xf6   :  { %v1322_v28 = vpop.trf.xlu0 }
  0xfa   :  { %v1324_v29 = vpop.trf.xlu0 }
  0xfb   :  { %v874_v30 = vpack.i.bf16 %v1324_v29, %v1322_v28 }
  0xfd   :  { %875 = vrot.lane.b32.xlu1 %v874_v30, %s1253_s2  ;;  %870 = vrot.lane.b32.xlu0 %v874_v30, %s1251_s15 }
  0xfe   :  { %v1330_v31 = vpop.trf.xlu0 }
 0x101   :  { %880 = vrot.lane.b32.xlu1 %v874_v30, %s1254_s22 }
 0x102   :  { %v1333_v32 = vpop.trf.xlu0 }
 0x103   :  { %v904_v36 = vpack.i.bf16 %v1333_v32, %v1330_v31 }
 0x105   :  { %885 = vrot.lane.b32.xlu1 %v874_v30, %s1255_s23 }
 0x106   :  { %v1336_v33 = vpop.trf.xlu0 }
 0x109   :  { %890 = vrot.lane.b32.xlu1 %v874_v30, %s1256_s24 }
 0x10a   :  { %v1339_v34 = vpop.trf.xlu0 }
 0x10b   :  { %v939_v35 = vpack.i.bf16 %v1339_v34, %v1336_v33 }
 0x10d   :  { %895 = vrot.lane.b32.xlu1 %v874_v30, %s1257_s25  ;;  %940 = vrot.lane.b32.xlu0 %v939_v35, %s1251_s15 }
 0x10e   :  { %v1353_v43 = vpop.trf.xlu0 }
 0x111   :  { %900 = vrot.lane.b32.xlu1 %v874_v30, %s1258_s26  ;;  %945 = vrot.lane.b32.xlu0 %v939_v35, %s1253_s2 }
 0x112   :  { %v1357_v47 = vpop.trf.xlu0 }
 0x113   :  { %v974_v52 = vpack.i.bf16 %v1357_v47, %v1353_v43 }
 0x115   :  { %905 = vrot.lane.b32.xlu1 %v904_v36, %s1251_s15  ;;  %950 = vrot.lane.b32.xlu0 %v939_v35, %s1254_s22 }
 0x116   :  { %v1363_v51 = vpop.trf.xlu0 }
 0x119   :  { %910 = vrot.lane.b32.xlu1 %v904_v36, %s1253_s2  ;;  %955 = vrot.lane.b32.xlu0 %v939_v35, %s1255_s23 }
 0x11a   :  { %v1369_v53 = vpop.trf.xlu0 }
 0x11b   :  { %v1004_v54 = vpack.i.bf16 %v1369_v53, %v1363_v51 }
 0x11d   :  { %915 = vrot.lane.b32.xlu1 %v904_v36, %s1254_s22  ;;  %960 = vrot.lane.b32.xlu0 %v939_v35, %s1256_s24 }
 0x11e   :  { %v1385_v55 = vpop.trf.xlu0 }
 0x121   :  { %920 = vrot.lane.b32.xlu1 %v904_v36, %s1255_s23  ;;  %965 = vrot.lane.b32.xlu0 %v939_v35, %s1257_s25 }
 0x122   :  { %v1388_v56 = vpop.trf.xlu0 }
 0x123   :  { %v1039_v57 = vpack.i.bf16 %v1388_v56, %v1385_v55 }
 0x125   :  { %925 = vrot.lane.b32.xlu1 %v904_v36, %s1256_s24  ;;  %970 = vrot.lane.b32.xlu0 %v939_v35, %s1258_s26 }
 0x126   :  { %v1398_v58 = vpop.trf.xlu0 }
 0x129   :  { %930 = vrot.lane.b32.xlu1 %v904_v36, %s1257_s25  ;;  %975 = vrot.lane.b32.xlu0 %v974_v52, %s1251_s15 }
 0x12a   :  { %v1401_v59 = vpop.trf.xlu0 }
 0x12b   :  { %v1074_v60 = vpack.i.bf16 %v1401_v59, %v1398_v58 }
 0x12d   :  { %935 = vrot.lane.b32.xlu1 %v904_v36, %s1258_s26  ;;  %980 = vrot.lane.b32.xlu0 %v974_v52, %s1253_s2 }
 0x12e   :  { %v1407_v61 = vpop.trf.xlu0 }
 0x131   :  { %985 = vrot.lane.b32.xlu0 %v974_v52, %s1254_s22  ;;  %1005 = vrot.lane.b32.xlu1 %v1004_v54, %s1251_s15 }
 0x132   :  { %v1410_v63 = vpop.trf.xlu0 }
 0x135   :  { %990 = vrot.lane.b32.xlu0 %v974_v52, %s1255_s23  ;;  %1010 = vrot.lane.b32.xlu1 %v1004_v54, %s1253_s2 }
 0x139   :  { %995 = vrot.lane.b32.xlu0 %v974_v52, %s1256_s24  ;;  %1015 = vrot.lane.b32.xlu1 %v1004_v54, %s1254_s22 }
 0x13d   :  { %1000 = vrot.lane.b32.xlu0 %v974_v52, %s1257_s25  ;;  %1020 = vrot.lane.b32.xlu1 %v1004_v54, %s1255_s23 }
 0x141   :  { %1140 = vrot.lane.b32.xlu0 %v974_v52, %s1258_s26  ;;  %1025 = vrot.lane.b32.xlu1 %v1004_v54, %s1256_s24 }
 0x145   :  { %1030 = vrot.lane.b32.xlu1 %v1004_v54, %s1257_s25 }
 0x149   :  { %1035 = vrot.lane.b32.xlu1 %v1004_v54, %s1258_s26 }
 0x14d   :  { %1040 = vrot.lane.b32.xlu1 %v1039_v57, %s1251_s15 }
 0x151   :  { %1045 = vrot.lane.b32.xlu1 %v1039_v57, %s1253_s2 }
 0x155   :  { %1050 = vrot.lane.b32.xlu1 %v1039_v57, %s1254_s22 }
 0x159   :  { %1055 = vrot.lane.b32.xlu1 %v1039_v57, %s1255_s23 }
 0x15d   :  { %1060 = vrot.lane.b32.xlu1 %v1039_v57, %s1256_s24 }
 0x161   :  { %1065 = vrot.lane.b32.xlu1 %v1039_v57, %s1257_s25 }
 0x165   :  { %1070 = vrot.lane.b32.xlu1 %v1039_v57, %s1258_s26 }
 0x169   :  { %1075 = vrot.lane.b32.xlu1 %v1074_v60, %s1251_s15 }
 0x16d   :  { %1080 = vrot.lane.b32.xlu1 %v1074_v60, %s1253_s2 }
 0x16f   :  { %v876_v62 = vpop.permute.xlu1 %875  ;;  %v871_v2 = vpop.permute.xlu0 %870 }
 0x170   :  { %v873_v4 = vunpack.i.h.bf16 %v871_v2  ;;  %v872_v5 = vunpack.i.l.bf16 %v871_v2  ;;  %v878_v8 = vunpack.i.h.bf16 %v876_v62  ;;  %v877_v9 = vunpack.i.l.bf16 %v876_v62 }
 0x171   :  { %1085 = vrot.lane.b32.xlu1 %v1074_v60, %s1254_s22 }
 0x172   :  { %v468_v10 = vsel %vm466_vm2, %v1324_v29, %v873_v4  ;;  %v467_v11 = vsel %vm466_vm2, %v1322_v28, %v872_v5  ;;  %v1434_v29 = vpack.i.bf16 %v1410_v63, %v1407_v61 }
 0x173   :  { %v881_v1 = vpop.permute.xlu1 %880  ;;  %v484_v19 = vsel %vm483_vm3, %v467_v11, %v877_v9  ;;  %v485_v20 = vsel %vm483_vm3, %v468_v10, %v878_v8 }
 0x174   :  { %v883_v12 = vunpack.i.h.bf16 %v881_v1  ;;  %v882_v13 = vunpack.i.l.bf16 %v881_v1 }
 0x175   :  { %1090 = vrot.lane.b32.xlu1 %v1074_v60, %s1255_s23 }
 0x176   :  { %v501_v23 = vsel %vm500_vm4, %v484_v19, %v882_v13  ;;  %v502_v24 = vsel %vm500_vm4, %v485_v20, %v883_v12 }
 0x177   :  { %v886_v3 = vpop.permute.xlu1 %885 }
 0x178   :  { %v888_v14 = vunpack.i.h.bf16 %v886_v3  ;;  %v887_v15 = vunpack.i.l.bf16 %v886_v3 }
 0x179   :  { %1095 = vrot.lane.b32.xlu1 %v1074_v60, %s1256_s24 }
 0x17a   :  { %v518_v25 = vsel %vm517_vm5, %v501_v23, %v887_v15  ;;  %v519_v26 = vsel %vm517_vm5, %v502_v24, %v888_v14 }
 0x17b   :  { %v891_v6 = vpop.permute.xlu1 %890 }
 0x17c   :  { %v893_v0 = vunpack.i.h.bf16 %v891_v6  ;;  %v892_v18 = vunpack.i.l.bf16 %v891_v6 }
 0x17d   :  { %1100 = vrot.lane.b32.xlu1 %v1074_v60, %s1257_s25 }
 0x17e   :  { %v535_v30 = vsel %vm534_vm6, %v518_v25, %v892_v18  ;;  %v536_v35 = vsel %vm534_vm6, %v519_v26, %v893_v0 }
 0x17f   :  { %v896_v16 = vpop.permute.xlu1 %895  ;;  %v1423_v17 = vpop.permute.xlu0 %940 }
 0x180   :  { %v898_v21 = vunpack.i.h.bf16 %v896_v16  ;;  %v897_v22 = vunpack.i.l.bf16 %v896_v16  ;;  %v943_v57 = vunpack.i.h.bf16 %v1423_v17 }
 0x181   :  { %1105 = vrot.lane.b32.xlu1 %v1074_v60, %s1258_s26  ;;  %v942_v60 = vunpack.i.l.bf16 %v1423_v17 }
 0x182   :  { %v552_v38 = vsel %vm551_vm7, %v535_v30, %v897_v22  ;;  %v553_v39 = vsel %vm551_vm7, %v536_v35, %v898_v21  ;;  %v472_v11 = vsel %vm466_vm2, %v1339_v34, %v943_v57 }
 0x183   :  { %v901_v27 = vpop.permute.xlu1 %900  ;;  %v946_v28 = vpop.permute.xlu0 %945  ;;  %v471_v12 = vsel %vm466_vm2, %v1336_v33, %v942_v60 }
 0x184   :  { %v903_v36 = vunpack.i.h.bf16 %v901_v27  ;;  %v902_v37 = vunpack.i.l.bf16 %v901_v27  ;;  %v948_v62 = vunpack.i.h.bf16 %v946_v28  ;;  %v947_v1 = vunpack.i.l.bf16 %v946_v28 }
 0x185   :  { %1110 = vrot.lane.b32.xlu1 %v1434_v29, %s1251_s15 }
 0x186   :  { %v569_v40 = vsel %vm568_vm8, %v552_v38, %v902_v37  ;;  %v570_v41 = vsel %vm568_vm8, %v553_v39, %v903_v36  ;;  %v488_v13 = vsel %vm483_vm3, %v471_v12, %v947_v1  ;;  %v489_v14 = vsel %vm483_vm3, %v472_v11, %v948_v62 }
 0x187   :  { %v906_v42 = vpop.permute.xlu1 %905  ;;  %v951_v44 = vpop.permute.xlu0 %950  ;;  %v611_v45 = vsel %vm595_vm9, %v569_v40, 0.0  ;;  %v612_v46 = vsel %vm595_vm9, %v570_v41, 0.0  ;;  %vm598_vm9 = vcmp.lt.s32.totalorder %v1416_v7, 32 }
 0x188   :  { %v627_v48 = vpack.c.bf16 %v612_v46, %v611_v45  ;;  %v908_v2 = vunpack.i.h.bf16 %v906_v42  ;;  %v907_v3 = vunpack.i.l.bf16 %v906_v42  ;;  %v953_v6 = vunpack.i.h.bf16 %v951_v44  ;;  %vm1536_vm13 = vmand %vm590_vm1, %vm598_vm9 }
 0x189   :  { %1115 = vrot.lane.b32.xlu1 %v1434_v29, %s1253_s2  ;;  %v952_v8 = vunpack.i.l.bf16 %v951_v44  ;;  %vm593_vm9 = vcmp.ge.s32.totalorder %v1416_v7, 48 }
 0x18a   :  { %831 = vmatprep.mubr.msk.bf16.mxu0 %vm647_vm10, %v627_v48  ;;  %v470_v15 = vsel %vm466_vm2, %v1333_v32, %v908_v2  ;;  %v469_v16 = vsel %vm466_vm2, %v1330_v31, %v907_v3  ;;  %v506_v19 = vsel %vm500_vm4, %v489_v14, %v953_v6  ;;  %vm609_vm12 = vmand %vm593_vm9, %vm601_vm11 }
 0x18b   :  { %v911_v49 = vpop.permute.xlu1 %910  ;;  %v956_v50 = vpop.permute.xlu0 %955  ;;  %v505_v18 = vsel %vm500_vm4, %v488_v13, %v952_v8 }
 0x18c   :  { %v913_v9 = vunpack.i.h.bf16 %v911_v49  ;;  %v912_v10 = vunpack.i.l.bf16 %v911_v49  ;;  %v958_v34 = vunpack.i.h.bf16 %v956_v50  ;;  %v957_v20 = vunpack.i.l.bf16 %v956_v50 }
 0x18d   :  { %1120 = vrot.lane.b32.xlu1 %v1434_v29, %s1254_s22 }
 0x18e   :  { %v486_v33 = vsel %vm483_vm3, %v469_v16, %v912_v10  ;;  %v487_v21 = vsel %vm483_vm3, %v470_v15, %v913_v9  ;;  %v522_v37 = vsel %vm517_vm5, %v505_v18, %v957_v20  ;;  %v523_v38 = vsel %vm517_vm5, %v506_v19, %v958_v34 }
 0x18f   :  { %v916_v52 = vpop.permute.xlu1 %915  ;;  %v961_v54 = vpop.permute.xlu0 %960 }
 0x190   :  { %v918_v22 = vunpack.i.h.bf16 %v916_v52  ;;  %v917_v23 = vunpack.i.l.bf16 %v916_v52  ;;  %v963_v32 = vunpack.i.h.bf16 %v961_v54  ;;  %v962_v24 = vunpack.i.l.bf16 %v961_v54 }
 0x191   :  { %1125 = vrot.lane.b32.xlu1 %v1434_v29, %s1255_s23 }
 0x192   :  { %v503_v41 = vsel %vm500_vm4, %v486_v33, %v917_v23  ;;  %v504_v42 = vsel %vm500_vm4, %v487_v21, %v918_v22  ;;  %v539_v46 = vsel %vm534_vm6, %v522_v37, %v962_v24  ;;  %v540_v48 = vsel %vm534_vm6, %v523_v38, %v963_v32 }
 0x193   :  { %v921_v4 = vpop.permute.xlu1 %920  ;;  %v966_v5 = vpop.permute.xlu0 %965 }
 0x194   :  { %v923_v31 = vunpack.i.h.bf16 %v921_v4  ;;  %v922_v25 = vunpack.i.l.bf16 %v921_v4  ;;  %v968_v26 = vunpack.i.h.bf16 %v966_v5  ;;  %v967_v27 = vunpack.i.l.bf16 %v966_v5 }
 0x195   :  { %1130 = vrot.lane.b32.xlu1 %v1434_v29, %s1256_s24 }
 0x196   :  { %v520_v49 = vsel %vm517_vm5, %v503_v41, %v922_v25  ;;  %v521_v50 = vsel %vm517_vm5, %v504_v42, %v923_v31  ;;  %v556_v52 = vsel %vm551_vm7, %v539_v46, %v967_v27  ;;  %v557_v54 = vsel %vm551_vm7, %v540_v48, %v968_v26 }
 0x197   :  { %v926_v17 = vpop.permute.xlu1 %925  ;;  %v971_v0 = vpop.permute.xlu0 %970 }
 0x198   :  { %v928_v28 = vunpack.i.h.bf16 %v926_v17  ;;  %v927_v30 = vunpack.i.l.bf16 %v926_v17  ;;  %v973_v39 = vunpack.i.h.bf16 %v971_v0  ;;  %v972_v40 = vunpack.i.l.bf16 %v971_v0 }
 0x199   :  { %1135 = vrot.lane.b32.xlu1 %v1434_v29, %s1257_s25 }
 0x19a   :  { %v537_v57 = vsel %vm534_vm6, %v520_v49, %v927_v30  ;;  %v538_v60 = vsel %vm534_vm6, %v521_v50, %v928_v28  ;;  %v573_v2 = vsel %vm568_vm8, %v556_v52, %v972_v40  ;;  %v574_v3 = vsel %vm568_vm8, %v557_v54, %v973_v39 }
 0x19b   :  { %v931_v35 = vpop.permute.xlu1 %930  ;;  %v976_v36 = vpop.permute.xlu0 %975  ;;  %v615_v11 = vsel %vm1494_vm15, %v573_v2, 0.0  ;;  %v616_v12 = vsel %vm1494_vm15, %v574_v3, 0.0  ;;  %vm592_vm15 = vcmp.ge.s32.totalorder %v1416_v7, 40 }
 0x19c   :  { %v933_v44 = vunpack.i.h.bf16 %v931_v35  ;;  %v932_v45 = vunpack.i.l.bf16 %v931_v35  ;;  %v629_v0 = vpack.c.bf16 %v616_v12, %v615_v11  ;;  %v978_v33 = vunpack.i.h.bf16 %v976_v36 }
 0x19d   :  { %1145 = vrot.lane.b32.xlu1 %v1434_v29, %s1258_s26  ;;  %v977_v21 = vunpack.i.l.bf16 %v976_v36 }
 0x19e   :  { %v554_v6 = vsel %vm551_vm7, %v537_v57, %v932_v45  ;;  %v555_v8 = vsel %vm551_vm7, %v538_v60, %v933_v44  ;;  %v474_v30 = vsel %vm466_vm2, %v1357_v47, %v978_v33 }
 0x19f   :  { %v936_v62 = vpop.permute.xlu1 %935  ;;  %v981_v1 = vpop.permute.xlu0 %980  ;;  %v473_v35 = vsel %vm466_vm2, %v1353_v43, %v977_v21 }
 0x1a0   :  { %v938_v4 = vunpack.i.h.bf16 %v936_v62  ;;  %v937_v5 = vunpack.i.l.bf16 %v936_v62  ;;  %v983_v22 = vunpack.i.h.bf16 %v981_v1  ;;  %v982_v23 = vunpack.i.l.bf16 %v981_v1 }
 0x1a2   :  { %v571_v9 = vsel %vm568_vm8, %v554_v6, %v937_v5  ;;  %v572_v10 = vsel %vm568_vm8, %v555_v8, %v938_v4  ;;  %v490_v38 = vsel %vm483_vm3, %v473_v35, %v982_v23  ;;  %v491_v39 = vsel %vm483_vm3, %v474_v30, %v983_v22 }
 0x1a3   :  { %v613_v13 = vsel %vm604_vm0, %v571_v9, 0.0  ;;  %v614_v14 = vsel %vm604_vm0, %v572_v10, 0.0  ;;  %v1006_v15 = vpop.permute.xlu1 %1005  ;;  %v986_v16 = vpop.permute.xlu0 %985  ;;  %vm600_vm0 = vcmp.lt.s32.totalorder %v1416_v7, 48 }
 0x1a4   :  { %v628_v17 = vpack.c.bf16 %v614_v14, %v613_v13  ;;  %v988_v32 = vunpack.i.h.bf16 %v986_v16  ;;  %v987_v24 = vunpack.i.l.bf16 %v986_v16  ;;  %v1008_v31 = vunpack.i.h.bf16 %v1006_v15  ;;  %vm608_vm1 = vmand %vm592_vm15, %vm600_vm0 }
 0x1a5   :  { %v1007_v43 = vunpack.i.l.bf16 %v1006_v15 }
 0x1a6   :  { %832 = vmatmul.mubr.msk.bf16.vlgmr.msra.gmra.mrb[0].mxu0 %vm647_vm10, %v628_v17  ;;  %v507_v42 = vsel %vm500_vm4, %v490_v38, %v987_v24  ;;  %v508_v44 = vsel %vm500_vm4, %v491_v39, %v988_v32  ;;  %v476_v47 = vsel %vm466_vm2, %v1369_v53, %v1008_v31 }
 0x1a7   :  { %v1011_v18 = vpop.permute.xlu1 %1010  ;;  %v991_v19 = vpop.permute.xlu0 %990  ;;  %835 = vmatprep.mubr.msk.bf16.mxu0 %vm647_vm10, %v629_v0  ;;  %v475_v12 = vsel %vm466_vm2, %v1363_v51, %v1007_v43 }
 0x1a8   :  { %v993_v25 = vunpack.i.h.bf16 %v991_v19  ;;  %v992_v26 = vunpack.i.l.bf16 %v991_v19  ;;  %v1013_v60 = vunpack.i.h.bf16 %v1011_v18  ;;  %v1012_v29 = vunpack.i.l.bf16 %v1011_v18 }
 0x1aa   :  { %v524_v45 = vsel %vm517_vm5, %v507_v42, %v992_v26  ;;  %v525_v46 = vsel %vm517_vm5, %v508_v44, %v993_v25  ;;  %v492_v16 = vsel %vm483_vm3, %v475_v12, %v1012_v29  ;;  %v493_v17 = vsel %vm483_vm3, %v476_v47, %v1013_v60 }
 0x1ab   :  { %v1016_v34 = vpop.permute.xlu1 %1015  ;;  %v996_v20 = vpop.permute.xlu0 %995 }
 0x1ac   :  { %v998_v36 = vunpack.i.h.bf16 %v996_v20  ;;  %v997_v37 = vunpack.i.l.bf16 %v996_v20  ;;  %v1018_v2 = vunpack.i.h.bf16 %v1016_v34  ;;  %v1017_v3 = vunpack.i.l.bf16 %v1016_v34 }
 0x1ae   :  { %v541_v50 = vsel %vm534_vm6, %v524_v45, %v997_v37  ;;  %v542_v52 = vsel %vm534_vm6, %v525_v46, %v998_v36  ;;  %v509_v19 = vsel %vm500_vm4, %v492_v16, %v1017_v3  ;;  %v510_v34 = vsel %vm500_vm4, %v493_v17, %v1018_v2 }
 0x1af   :  { %v1021_v27 = vpop.permute.xlu1 %1020  ;;  %v1001_v28 = vpop.permute.xlu0 %1000 }
 0x1b0   :  { %v1003_v40 = vunpack.i.h.bf16 %v1001_v28  ;;  %v1002_v41 = vunpack.i.l.bf16 %v1001_v28  ;;  %v1023_v6 = vunpack.i.h.bf16 %v1021_v27  ;;  %v1022_v8 = vunpack.i.l.bf16 %v1021_v27 }
 0x1b2   :  { %v558_v62 = vsel %vm551_vm7, %v541_v50, %v1002_v41  ;;  %v559_v1 = vsel %vm551_vm7, %v542_v52, %v1003_v40  ;;  %v526_v20 = vsel %vm517_vm5, %v509_v19, %v1022_v8  ;;  %v527_v33 = vsel %vm517_vm5, %v510_v34, %v1023_v6 }
 0x1b3   :  { %v1026_v48 = vpop.permute.xlu1 %1025  ;;  %v1141_v49 = vpop.permute.xlu0 %1140 }
 0x1b4   :  { %v1143_v53 = vunpack.i.h.bf16 %v1141_v49  ;;  %v1142_v57 = vunpack.i.l.bf16 %v1141_v49  ;;  %v1028_v13 = vunpack.i.h.bf16 %v1026_v48  ;;  %v1027_v14 = vunpack.i.l.bf16 %v1026_v48 }
 0x1b6   :  { %v575_v4 = vsel %vm568_vm8, %v558_v62, %v1142_v57  ;;  %v576_v5 = vsel %vm568_vm8, %v559_v1, %v1143_v53  ;;  %v543_v21 = vsel %vm534_vm6, %v526_v20, %v1027_v14  ;;  %v544_v22 = vsel %vm534_vm6, %v527_v33, %v1028_v13 }
 0x1b7   :  { %v617_v9 = vsel %vm1536_vm13, %v575_v4, 0.0  ;;  %v618_v10 = vsel %vm1536_vm13, %v576_v5, 0.0  ;;  %v1031_v11 = vpop.permute.xlu1 %1030  ;;  %vm594_vm13 = vcmp.ge.s32.totalorder %v1416_v7, 56 }
 0x1b8   :  { %v630_v15 = vpack.c.bf16 %v618_v10, %v617_v9  ;;  %v1033_v0 = vunpack.i.h.bf16 %v1031_v11  ;;  %v1032_v18 = vunpack.i.l.bf16 %v1031_v11 }
 0x1ba   :  { %836 = vmatmul.mubr.msk.bf16.gmra.mrb[4].mxu0 %vm647_vm10, %v630_v15  ;;  %v560_v24 = vsel %vm551_vm7, %v543_v21, %v1032_v18  ;;  %v561_v31 = vsel %vm551_vm7, %v544_v22, %v1033_v0 }
 0x1bb   :  { %v1036_v51 = vpop.permute.xlu1 %1035 }
 0x1bc   :  { %v1038_v23 = vunpack.i.h.bf16 %v1036_v51  ;;  %v1037_v32 = vunpack.i.l.bf16 %v1036_v51 }
 0x1be   :  { %v577_v25 = vsel %vm568_vm8, %v560_v24, %v1037_v32  ;;  %v578_v26 = vsel %vm568_vm8, %v561_v31, %v1038_v23 }
 0x1bf   :  { %v1041_v27 = vpop.permute.xlu1 %1040  ;;  %v619_v28 = vsel %vm607_vm14, %v577_v25, 0.0  ;;  %v620_v30 = vsel %vm607_vm14, %v578_v26, 0.0  ;;  %vm602_vm14 = vcmp.lt.s32.totalorder %v1416_v7, 64 }
 0x1c0   :  { %v631_v35 = vpack.c.bf16 %v620_v30, %v619_v28  ;;  %v1043_v40 = vunpack.i.h.bf16 %v1041_v27  ;;  %v1042_v41 = vunpack.i.l.bf16 %v1041_v27 }
 0x1c2   :  { %839 = vmatprep.mubr.msk.bf16.mxu1 %vm647_vm10, %v631_v35  ;;  %v478_v49 = vsel %vm466_vm2, %v1388_v56, %v1043_v40  ;;  %v477_v50 = vsel %vm466_vm2, %v1385_v55, %v1042_v41 }
 0x1c3   :  { %v1046_v36 = vpop.permute.xlu1 %1045 }
 0x1c4   :  { %v1048_v42 = vunpack.i.h.bf16 %v1046_v36  ;;  %v1047_v44 = vunpack.i.l.bf16 %v1046_v36 }
 0x1c6   :  { %v494_v53 = vsel %vm483_vm3, %v477_v50, %v1047_v44  ;;  %v495_v57 = vsel %vm483_vm3, %v478_v49, %v1048_v42 }
 0x1c7   :  { %v1051_v37 = vpop.permute.xlu1 %1050 }
 0x1c8   :  { %v1053_v47 = vunpack.i.h.bf16 %v1051_v37  ;;  %v1052_v43 = vunpack.i.l.bf16 %v1051_v37 }
 0x1ca   :  { %v511_v62 = vsel %vm500_vm4, %v494_v53, %v1052_v43  ;;  %v512_v1 = vsel %vm500_vm4, %v495_v57, %v1053_v47 }
 0x1cb   :  { %v1056_v38 = vpop.permute.xlu1 %1055 }
 0x1cc   :  { %v1058_v45 = vunpack.i.h.bf16 %v1056_v38  ;;  %v1057_v46 = vunpack.i.l.bf16 %v1056_v38 }
 0x1ce   :  { %v528_v2 = vsel %vm517_vm5, %v511_v62, %v1057_v46  ;;  %v529_v3 = vsel %vm517_vm5, %v512_v1, %v1058_v45 }
 0x1cf   :  { %v1061_v39 = vpop.permute.xlu1 %1060 }
 0x1d0   :  { %v1063_v52 = vunpack.i.h.bf16 %v1061_v39  ;;  %v1062_v54 = vunpack.i.l.bf16 %v1061_v39 }
 0x1d2   :  { %v545_v4 = vsel %vm534_vm6, %v528_v2, %v1062_v54  ;;  %v546_v55 = vsel %vm534_vm6, %v529_v3, %v1063_v52 }
 0x1d3   :  { %v1066_v48 = vpop.permute.xlu1 %1065 }
 0x1d4   :  { %v1068_v60 = vunpack.i.h.bf16 %v1066_v48  ;;  %v1067_v29 = vunpack.i.l.bf16 %v1066_v48 }
 0x1d6   :  { %v562_v8 = vsel %vm551_vm7, %v545_v4, %v1067_v29  ;;  %v563_v9 = vsel %vm551_vm7, %v546_v55, %v1068_v60 }
 0x1d7   :  { %v1071_v56 = vpop.permute.xlu1 %1070 }
 0x1d8   :  { %v1073_v5 = vunpack.i.h.bf16 %v1071_v56  ;;  %v1072_v6 = vunpack.i.l.bf16 %v1071_v56 }
 0x1da   :  { %v579_v10 = vsel %vm568_vm8, %v562_v8, %v1072_v6  ;;  %v580_v11 = vsel %vm568_vm8, %v563_v9, %v1073_v5 }
 0x1db   :  { %v621_v12 = vsel %vm608_vm1, %v579_v10, 0.0  ;;  %v622_v13 = vsel %vm608_vm1, %v580_v11, 0.0  ;;  %v1076_v14 = vpop.permute.xlu1 %1075 }
 0x1dc   :  { %v632_v15 = vpack.c.bf16 %v622_v13, %v621_v12  ;;  %v1078_v19 = vunpack.i.h.bf16 %v1076_v14  ;;  %v1077_v34 = vunpack.i.l.bf16 %v1076_v14 }
 0x1de   :  { %840 = vmatmul.mubr.msk.bf16.vlgmr.msra.gmra.mrb[0].mxu1 %vm647_vm10, %v632_v15  ;;  %v480_v24 = vsel %vm466_vm2, %v1401_v59, %v1078_v19  ;;  %v479_v31 = vsel %vm466_vm2, %v1398_v58, %v1077_v34 }
 0x1df   :  { %v1081_v16 = vpop.permute.xlu1 %1080 }
 0x1e0   :  { %v1083_v20 = vunpack.i.h.bf16 %v1081_v16  ;;  %v1082_v33 = vunpack.i.l.bf16 %v1081_v16 }
 0x1e2   :  { %v496_v27 = vsel %vm483_vm3, %v479_v31, %v1082_v33  ;;  %v497_v28 = vsel %vm483_vm3, %v480_v24, %v1083_v20 }
 0x1e3   :  { %v1086_v17 = vpop.permute.xlu1 %1085 }
 0x1e4   :  { %v1088_v51 = vunpack.i.h.bf16 %v1086_v17  ;;  %v1087_v21 = vunpack.i.l.bf16 %v1086_v17 }
 0x1e6   :  { %v513_v36 = vsel %vm500_vm4, %v496_v27, %v1087_v21  ;;  %v514_v37 = vsel %vm500_vm4, %v497_v28, %v1088_v51 }
 0x1e7   :  { %v1091_v0 = vpop.permute.xlu1 %1090 }
 0x1e8   :  { %v1093_v22 = vunpack.i.h.bf16 %v1091_v0  ;;  %v1092_v23 = vunpack.i.l.bf16 %v1091_v0 }
 0x1ea   :  { %v530_v38 = vsel %vm517_vm5, %v513_v36, %v1092_v23  ;;  %v531_v39 = vsel %vm517_vm5, %v514_v37, %v1093_v22 }
 0x1eb   :  { %v1096_v18 = vpop.permute.xlu1 %1095 }
 0x1ec   :  { %v1098_v25 = vunpack.i.h.bf16 %v1096_v18  ;;  %v1097_v26 = vunpack.i.l.bf16 %v1096_v18 }
 0x1ee   :  { %v547_v40 = vsel %vm534_vm6, %v530_v38, %v1097_v26  ;;  %v548_v58 = vsel %vm534_vm6, %v531_v39, %v1098_v25 }
 0x1ef   :  { %v1101_v32 = vpop.permute.xlu1 %1100 }
 0x1f0   :  { %v1103_v30 = vunpack.i.h.bf16 %v1101_v32  ;;  %v1102_v35 = vunpack.i.l.bf16 %v1101_v32 }
 0x1f2   :  { %v564_v44 = vsel %vm551_vm7, %v547_v40, %v1102_v35  ;;  %v565_v47 = vsel %vm551_vm7, %v548_v58, %v1103_v30 }
 0x1f3   :  { %v1106_v59 = vpop.permute.xlu1 %1105 }
 0x1f4   :  { %v1108_v41 = vunpack.i.h.bf16 %v1106_v59  ;;  %v1107_v42 = vunpack.i.l.bf16 %v1106_v59 }
 0x1f6   :  { %v581_v43 = vsel %vm568_vm8, %v564_v44, %v1107_v42  ;;  %v582_v45 = vsel %vm568_vm8, %v565_v47, %v1108_v41 }
 0x1f7   :  { %v623_v46 = vsel %vm609_vm12, %v581_v43, 0.0  ;;  %v624_v48 = vsel %vm609_vm12, %v582_v45, 0.0  ;;  %v1111_v49 = vpop.permute.xlu1 %1110 }
 0x1f8   :  { %v633_v50 = vpack.c.bf16 %v624_v48, %v623_v46  ;;  %v1113_v60 = vunpack.i.h.bf16 %v1111_v49  ;;  %v1112_v29 = vunpack.i.l.bf16 %v1111_v49 }
 0x1fa   :  { %843 = vmatprep.mubr.msk.bf16.mxu1 %vm647_vm10, %v633_v50  ;;  %v482_v5 = vsel %vm466_vm2, %v1410_v63, %v1113_v60  ;;  %v481_v6 = vsel %vm466_vm2, %v1407_v61, %v1112_v29  ;;  %vm610_vm2 = vmand %vm594_vm13, %vm602_vm14 }
 0x1fb   :  { %v1116_v52 = vpop.permute.xlu1 %1115 }
 0x1fc   :  { %v1118_v62 = vunpack.i.h.bf16 %v1116_v52  ;;  %v1117_v1 = vunpack.i.l.bf16 %v1116_v52 }
 0x1fe   :  { %v498_v10 = vsel %vm483_vm3, %v481_v6, %v1117_v1  ;;  %v499_v11 = vsel %vm483_vm3, %v482_v5, %v1118_v62 }
 0x1ff   :  { %v1121_v54 = vpop.permute.xlu1 %1120 }
 0x200   :  { %v1123_v2 = vunpack.i.h.bf16 %v1121_v54  ;;  %v1122_v3 = vunpack.i.l.bf16 %v1121_v54 }
 0x202   :  { %v515_v14 = vsel %vm500_vm4, %v498_v10, %v1122_v3  ;;  %v516_v15 = vsel %vm500_vm4, %v499_v11, %v1123_v2 }
 0x203   :  { %v1126_v53 = vpop.permute.xlu1 %1125 }
 0x204   :  { %v1128_v56 = vunpack.i.h.bf16 %v1126_v53  ;;  %v1127_v4 = vunpack.i.l.bf16 %v1126_v53 }
 0x206   :  { %v532_v16 = vsel %vm517_vm5, %v515_v14, %v1127_v4  ;;  %v533_v17 = vsel %vm517_vm5, %v516_v15, %v1128_v56 }
 0x207   :  { %v1131_v57 = vpop.permute.xlu1 %1130 }
 0x208   :  { %v1133_v8 = vunpack.i.h.bf16 %v1131_v57  ;;  %v1132_v9 = vunpack.i.l.bf16 %v1131_v57 }
 0x20a   :  { %v549_v0 = vsel %vm534_vm6, %v532_v16, %v1132_v9  ;;  %v550_v61 = vsel %vm534_vm6, %v533_v17, %v1133_v8 }
 0x20b   :  { %v1136_v55 = vpop.permute.xlu1 %1135 }
 0x20c   :  { %v1138_v12 = vunpack.i.h.bf16 %v1136_v55  ;;  %v1137_v13 = vunpack.i.l.bf16 %v1136_v55 }
 0x20e   :  { %v566_v34 = vsel %vm551_vm7, %v549_v0, %v1137_v13  ;;  %v567_v20 = vsel %vm551_vm7, %v550_v61, %v1138_v12 }
 0x20f   :  { %v1146_v63 = vpop.permute.xlu1 %1145 }
 0x210   :  { %v1148_v18 = vunpack.i.h.bf16 %v1146_v63  ;;  %v1147_v19 = vunpack.i.l.bf16 %v1146_v63 }
 0x212   :  { %v583_v33 = vsel %vm568_vm8, %v566_v34, %v1147_v19  ;;  %v584_v51 = vsel %vm568_vm8, %v567_v20, %v1148_v18 }
 0x213   :  { %v625_v21 = vsel %vm610_vm2, %v583_v33, 0.0  ;;  %v626_v22 = vsel %vm610_vm2, %v584_v51, 0.0 }
 0x214   :  { %v634_v23 = vpack.c.bf16 %v626_v22, %v625_v21 }
 0x216   :  { %844 = vmatmul.mubr.msk.bf16.gmra.mrb[4].mxu1 %vm647_vm10, %v634_v23 }
 0x279   :  { %v833_v32 = vpop.f32.mrb[0].mxu0 }
 0x27a   :  { %771 = vst [vmem:[#allocation8 + $0x10] sm:$0xff] %v833_v32  ;;  %v706_v24 = vpop.f32.mrb[1].mxu0 }
 0x27b   :  { %769 = vst [vmem:[#allocation8] sm:$0xff] %v706_v24  ;;  %v834_v7 = vpop.f32.mrb[2].mxu0 }
 0x27c   :  { %772 = vst [vmem:[#allocation8 + $0x18] sm:$0xff] %v834_v7  ;;  %v709_v31 = vpop.f32.mrb[3].mxu0 }
 0x27d   :  { %770 = vst [vmem:[#allocation8 + $0x8] sm:$0xff] %v709_v31 }
 0x28d   :  { %v837_v25 = vpop.f32.mrb[4].mxu0 }
 0x28e   :  { %775 = vst [vmem:[#allocation8 + $0x30] sm:$0xff] %v837_v25  ;;  %v722_v26 = vpop.f32.mrb[5].mxu0 }
 0x28f   :  { %773 = vst [vmem:[#allocation8 + $0x20] sm:$0xff] %v722_v26  ;;  %v838_v27 = vpop.f32.mrb[6].mxu0 }
 0x290   :  { %776 = vst [vmem:[#allocation8 + $0x38] sm:$0xff] %v838_v27  ;;  %v725_v28 = vpop.f32.mrb[7].mxu0 }
 0x291   :  { %774 = vst [vmem:[#allocation8 + $0x28] sm:$0xff] %v725_v28 }
 0x2b1   :  { %v841_v30 = vpop.f32.mrb[0].mxu1 }
 0x2b2   :  { %779 = vst [vmem:[#allocation8 + $0x50] sm:$0xff] %v841_v30  ;;  %v738_v35 = vpop.f32.mrb[1].mxu1 }
 0x2b3   :  { %777 = vst [vmem:[#allocation8 + $0x40] sm:$0xff] %v738_v35  ;;  %v842_v36 = vpop.f32.mrb[2].mxu1 }
 0x2b4   :  { %780 = vst [vmem:[#allocation8 + $0x58] sm:$0xff] %v842_v36  ;;  %v741_v37 = vpop.f32.mrb[3].mxu1 }
 0x2b5   :  { %778 = vst [vmem:[#allocation8 + $0x48] sm:$0xff] %v741_v37 }
 0x2e9   :  { %v845_v38 = vpop.f32.mrb[4].mxu1 }
 0x2ea   :  { %783 = vst [vmem:[#allocation8 + $0x70] sm:$0xff] %v845_v38  ;;  %v754_v39 = vpop.f32.mrb[5].mxu1 }
 0x2eb   :  { %781 = vst [vmem:[#allocation8 + $0x60] sm:$0xff] %v754_v39  ;;  %v846_v59 = vpop.f32.mrb[6].mxu1 }
 0x2ec   :  { %784 = vst [vmem:[#allocation8 + $0x78] sm:$0xff] %v846_v59  ;;  %v757_v40 = vpop.f32.mrb[7].mxu1 }
 0x2ed   :  { %782 = vst [vmem:[#allocation8 + $0x68] sm:$0xff] %v757_v40 }
 0x2ee   :  { %1230 = shalt.err (!%p1227_p0)
}
 0x2ef   :  { %s1231_s5 = scalar_lea.hbm %s1655_s3, 2048 }
 0x2f0   :  { %p1232_p1 = scmp.ne.s32.totalorder %s1655_s3, %s1231_s5  ;;  %p1235_p2 = scmp.lt.u32.totalorder %s1231_s5, %s1655_s3 }
 0x2f2   :  { %p1237_p3 = pnand %p1235_p2, %p1232_p1 }
 0x2f4   :  { %1240 = shalt.err (!%p1237_p3)
}
 0x2f5   :  { %796 = dma.vmem_to_hbm [thread:$0]  %s791_s28, 2048, %s1655_s3, [#allocation4], %s1250_s0, %s1250_s0, %s1251_s15  }
 0x2f6   :  { %1245 = dma.done.wait [#allocation4], 2048  }
 0x2f7   :  { %1246 = vsyncadd [#allocation4], 4294965248 }
 0x2f8   :  { %800 = vsyncpa [#allocation3], 1 }
 0x2f9   :  { %801 = vsyncpa [#allocation6], 1 }
 0x2fa   :  { %802 = vsyncpa [#allocation4], 1 }

</bundles_post_ra>
